<compile_context>
chip_gen: v6e
topology: v6e:2x2x1
jax: 0.10.0
libtpu: 0.0.40
codegen_flags: <defaults>
</compile_context>

<pallas_src>
import math

import jax
import jax.numpy as jnp
from jax.experimental import pallas as pl
from jax.experimental.pallas import tpu as pltpu


def _build_pe_table(d_model: int, max_len: int = 20) -> jnp.ndarray:
    """Deterministic sinusoidal PE table, identical to the PyTorch __init__."""
    position = jnp.arange(0, max_len, dtype=jnp.float32)[:, None]            # (max_len, 1)
    div_term = jnp.exp(
        jnp.arange(0, d_model, 2, dtype=jnp.float32) * (-math.log(10000.0) / d_model)
    )                                                                         # (d_model//2,)
    pe = jnp.zeros((max_len, d_model), dtype=jnp.float32)
    pe = pe.at[:, 0::2].set(jnp.sin(position * div_term))
    pe = pe.at[:, 1::2].set(jnp.cos(position * div_term))
    return pe


def _pe_add_kernel(x_ref, pe_ref, o_ref):
    # Same-shape tiles -> no in-kernel broadcast; explicit cast keeps low-precision I/O safe.
    o_ref[...] = (x_ref[...] + pe_ref[...]).astype(o_ref.dtype)


def positional_encoding_forward(x: jnp.ndarray, pe: jnp.ndarray) -> jnp.ndarray:
    """x: (B, S, D); pe: (max_len, D).  Returns x + pe[:S][None]."""
    B, S, D = x.shape
    max_len = pe.shape[0]
    if S > max_len:
        raise ValueError(f"sequence length {S} exceeds positional-encoding max_len {max_len}")

    dtype = x.dtype
    itemsize = jnp.dtype(dtype).itemsize
    SUB = 8 * (4 // itemsize)            # sublane quantum: 8 (f32), 16 (bf16), 32 (int8/fp8)
    LANE = 128

    # Lane-dense layout: fold (S, D) into one trailing axis.
    SD = S * D
    xf = x.reshape(B, SD)
    pe_row = pe[:S, :].astype(dtype).reshape(1, SD)   # pre-cast: kernel stays promotion-free

    # Row (batch) tile: a multiple of the sublane quantum, or the full batch dim.
    if B >= SUB:
        TB = min((B // SUB) * SUB, 4 * SUB)
    else:
        TB = B

    # Column tile: multiple of 128 (or the full SD), targeting ~2 MiB per block.
    target_block_bytes = 2 * 1024 * 1024
    max_tc = max(LANE, (target_block_bytes // (TB * itemsize)) // LANE * LANE)
    TC = SD if SD <= max_tc else max_tc

    # Replicate the (tiny, <= max_len rows) PE slab across the row tile so the
    # kernel is a pure same-shape add.
    pe_rep = jnp.broadcast_to(pe_row, (TB, SD))

    block_bytes = TB * TC * itemsize
    # Double-buffered x-in + pe-in + out = ~6 blocks; leave generous headroom,
    # but stay well under v7x's 64 MiB physical VMEM.
    vmem_limit = int(min(96 * 2**20, max(16 * 2**20, 10 * block_bytes)))

    grid = (pl.cdiv(B, TB), pl.cdiv(SD, TC))

    out_flat = pl.pallas_call(
        _pe_add_kernel,
        out_shape=jax.ShapeDtypeStruct((B, SD), dtype),
        grid_spec=pltpu.PrefetchScalarGridSpec(
            num_scalar_prefetch=0,
            grid=grid,
            in_specs=[
                pl.BlockSpec((TB, TC), lambda i, j: (i, j)),   # x tile
                pl.BlockSpec((TB, TC), lambda i, j: (0, j)),   # shared PE tile
            ],
            out_specs=pl.BlockSpec((TB, TC), lambda i, j: (i, j)),
        ),
        compiler_params=pltpu.CompilerParams(
            dimension_semantics=("parallel", "parallel"),
            vmem_limit_bytes=vmem_limit,
        ),
    )(xf, pe_rep)

    return out_flat.reshape(B, S, D)


if __name__ == "__main__":
    # Small shapes consistent with the module's forward: x is (batch, seq, d_model)
    B, S, D = 2, 8, 32
    MAX_LEN = 20

    key = jax.random.PRNGKey(0)
    x = jax.random.normal(key, (B, S, D), dtype=jnp.float32)

    pe = _build_pe_table(D, MAX_LEN)

    out = jax.block_until_ready(positional_encoding_forward(x, pe))

    # Reference check (plain JAX, mirrors the PyTorch forward exactly)
    ref = x + pe[:S, :][None, :, :]
    assert out.shape == (B, S, D)
    assert jnp.allclose(out, ref, atol=1e-6), "mismatch vs reference"

    print("KERNEL_OK")
</pallas_src>

<mosaic_0001>
module attributes {stable_mosaic.version = 11 : i64} {
  func.func @_pe_add_kernel(%arg0: i32, %arg1: i32, %arg2: memref<2x256xf32, #tpu.memory_space<vmem>>, %arg3: memref<2x256xf32, #tpu.memory_space<vmem>>, %arg4: memref<2x256xf32, #tpu.memory_space<vmem>>) attributes {dimension_semantics = [#tpu.dimension_semantics<parallel>, #tpu.dimension_semantics<parallel>], iteration_bounds = array<i64: 1, 1>, scalar_prefetch = 0 : i64, scratch_operands = 0 : i64, tpu.core_type = #tpu.core_type<tc>, window_params = [{transform_indices = @transform_0, window_bounds = array<i64: 2, 256>}, {transform_indices = @transform_1, window_bounds = array<i64: 2, 256>}, {transform_indices = @transform_2, window_bounds = array<i64: 2, 256>}]} {
    %c0 = arith.constant 0 : index
    %c0_0 = arith.constant 0 : index
    %0 = vector.load %arg2[%c0, %c0_0] : memref<2x256xf32, #tpu.memory_space<vmem>>, vector<2x256xf32>
    %c0_1 = arith.constant 0 : index
    %c0_2 = arith.constant 0 : index
    %1 = vector.load %arg3[%c0_1, %c0_2] : memref<2x256xf32, #tpu.memory_space<vmem>>, vector<2x256xf32>
    %2 = arith.addf %0, %1 : vector<2x256xf32>
    %c0_3 = arith.constant 0 : index
    %c0_4 = arith.constant 0 : index
    %3 = vector.load %arg4[%c0_3, %c0_4] : memref<2x256xf32, #tpu.memory_space<vmem>>, vector<2x256xf32>
    tpu.vector_store %arg4[%c0_3, %c0_4], %2 {strides = array<i32>} : memref<2x256xf32, #tpu.memory_space<vmem>>, vector<2x256xf32>,
    return
  }
  func.func @transform_0(%arg0: i32, %arg1: i32) -> (i32, i32) {
    %c0_i32 = arith.constant 0 : i32
    return %arg0, %arg1 : i32, i32
  }
  func.func @transform_1(%arg0: i32, %arg1: i32) -> (i32, i32) {
    %c0_i32 = arith.constant 0 : i32
    %c0_i32_0 = arith.constant 0 : i32
    return %c0_i32, %arg1 : i32, i32
  }
  func.func @transform_2(%arg0: i32, %arg1: i32) -> (i32, i32) {
    %c0_i32 = arith.constant 0 : i32
    return %arg0, %arg1 : i32, i32
  }
}

</mosaic_0001>

<bundles_post_ra>
// kernel: tpu_custom_call.1
= control target key start
LH: loop header
LB: loop body
LE: loop exit
PB: predicated region body
PF: predicated region fallthrough
CT: control target
= control target key end

     0   :  { %7 = vsyncpa [#allocation3], 0  ;;  %s152_s0 = inlined_call_operand.hbm [shape: f32[2,256], index: 0, kind: input, shape index: {}]   ;;  %s153_s1 = inlined_call_operand.hbm [shape: f32[2,256], index: 1, kind: input, shape index: {}]   ;;  %s154_s2 = inlined_call_operand.hbm [shape: f32[2,256], index: 2, kind: output, shape index: {}]  }
   0x1   :  { %8 = vsyncpa [#allocation6], 0 }
   0x2   :  { %9 = vsyncpa [#allocation4], 0  ;;  %s125_s9 = smov [#allocation2]   ;;  %s126_s11 = smov [#allocation5]  }
   0x3   :  { %s16_s10 = sshll.u32 %s125_s9, 4  ;;  %s26_s12 = sshll.u32 %s126_s11, 4  ;;  %s17_s10 = int_to_ptr.vmem [resolvable:$true] %s16_s10  ;;  %s27_s12 = int_to_ptr.vmem [resolvable:$true] %s26_s12 }
   0x4   :  { %s67_s13 = scalar_lea.vmem %s17_s10, 64  ;;  %p72_p1 = scmp.lt.s32.totalorder %s17_s10, %s17_s10 }
   0x5   :  { %p68_p0 = scmp.ne.s32.totalorder %s17_s10, %s67_s13  ;;  %p73_p2 = scmp.lt.s32.totalorder %s67_s13, %s67_s13 }
   0x7   :  { %p74_p3 = por %p73_p2, %p72_p1 }
   0x9   :  { %p75_p4 = pnand %p74_p3, %p68_p0 }
   0xb   :  { %78 = shalt.err (!%p75_p4)
}
   0xc   :  { %19 = dma.hbm_to_vmem [thread:$0]  %s152_s0, 64, %s17_s10, [#allocation3]  }
   0xd   :  { %s87_s16 = scalar_lea.vmem %s27_s12, 64  ;;  %p92_p6 = scmp.lt.s32.totalorder %s27_s12, %s27_s12 }
   0xe   :  { %p88_p5 = scmp.ne.s32.totalorder %s27_s12, %s87_s16  ;;  %p93_p7 = scmp.lt.s32.totalorder %s87_s16, %s87_s16 }
  0x10   :  { %p94_p8 = por %p93_p7, %p92_p6 }
  0x12   :  { %p95_p9 = pnand %p94_p8, %p88_p5 }
  0x14   :  { %98 = shalt.err (!%p95_p9)
}
  0x15   :  { %29 = dma.hbm_to_vmem [thread:$0]  %s153_s1, 64, %s27_s12, [#allocation6]  }
  0x16   :  { %119 = dma.done.wait [#allocation3], 64  }
  0x17   :  { %120 = vsyncadd [#allocation3], 4294967232 }
  0x18   :  { %121 = dma.done.wait [#allocation6], 64  }
  0x19   :  { %122 = vsyncadd [#allocation6], 4294967232  ;;  %s127_s19 = smov [#allocation7]   ;;  %v36_v0 = vld [vmem:[#allocation2] sm:$0xf] }
  0x1a   :  { %s46_s20 = sshll.u32 %s127_s19, 4  ;;  %v37_v1 = vld [vmem:[#allocation5] sm:$0xf]  ;;  %s47_s20 = int_to_ptr.vmem [resolvable:$true] %s46_s20 }
  0x1b   :  { %v38_v2 = vadd.f32 %v37_v1, %v36_v0  ;;  %s99_s0 = scalar_lea.vmem %s47_s20, 64  ;;  %p104_p11 = scmp.lt.s32.totalorder %s47_s20, %s47_s20 }
  0x1c   :  { %p100_p10 = scmp.ne.s32.totalorder %s47_s20, %s99_s0  ;;  %p105_p12 = scmp.lt.s32.totalorder %s99_s0, %s99_s0 }
  0x1d   :  { %39 = vst [vmem:[#allocation7] sm:$0xf] %v38_v2 }
  0x1e   :  { %p106_p13 = por %p105_p12, %p104_p11 }
  0x20   :  { %p107_p0 = pnand %p106_p13, %p100_p10 }
  0x22   :  { %110 = shalt.err (!%p107_p0)
}
  0x23   :  { %49 = dma.vmem_to_hbm [thread:$0]  %s47_s20, 64, %s154_s2, [#allocation4]  }
  0x24   :  { %123 = dma.done.wait [#allocation4], 64  }
  0x25   :  { %124 = vsyncadd [#allocation4], 4294967232 }
  0x26   :  { %53 = vsyncpa [#allocation3], 1 }
  0x27   :  { %54 = vsyncpa [#allocation6], 1 }
  0x28   :  { %55 = vsyncpa [#allocation4], 1 }

</bundles_post_ra>
